<compile_context>
chip_gen: v5e
topology: v5e:2x2
jax: 0.10.0
libtpu: 0.0.40
codegen_flags: <defaults>
</compile_context>

<pallas_src>
import math

import numpy as np
import jax
import jax.numpy as jnp
from jax import lax
from jax.experimental import pallas as pl
from jax.experimental.pallas import tpu as pltpu

J = 23           # number of joints
TF_MAX = 8192    # max frames (lanes) per grid step -- sweepable 2048..16384
CH = 128         # frames per inner compute chunk (keeps vreg pressure low)
MIN_STEPS = 4    # keep >= this many grid steps when F allows (v7x: 2 TCs)


def _round_up(x: int, m: int) -> int:
    return ((x + m - 1) // m) * m


def _cdiv(a: int, b: int) -> int:
    return -(-a // b)


# ----------------------------------------------------------------------------
# Parameter construction (plain numpy / JAX glue, deterministic)
# ----------------------------------------------------------------------------
def make_body_mapper() -> np.ndarray:
    """Numpy port of makeBodyMapper(): (23, 69, 66) float32."""
    base = np.zeros((23, 23 * 3, 22 * 3), dtype=np.float32)
    eye = np.eye(3, dtype=np.float32)

    def tile_eye(n):
        return np.concatenate([eye] * n, axis=0)

    for i in range(23):
        if i == 0:
            base[i][1 * 3:15 * 3, :3] = tile_eye(14)
            base[i][15 * 3:19 * 3, 14 * 3:15 * 3] = tile_eye(4)
            base[i][19 * 3:23 * 3, 18 * 3:19 * 3] = tile_eye(4)
        elif 1 <= i <= 3:
            start_row, end_row = i + 1, 15
            base[i][start_row * 3:end_row * 3, 3 * i:3 * (i + 1)] = tile_eye(14 - i)
        elif i == 4:
            start_row, end_row = i + 1, 7
            base[i][start_row * 3:end_row * 3, 3 * i:3 * (i + 1)] = tile_eye(2)
            base[i][end_row * 3:(end_row + 4) * 3, 3 * (i + 2):3 * (i + 3)] = tile_eye(4)
            base[i][(end_row + 4) * 3:(end_row + 8) * 3, 3 * (i + 6):3 * (i + 7)] = tile_eye(4)
        elif i == 5:
            start_row, end_row = i + 1, 7
            base[i][start_row * 3:end_row * 3, 3 * i:3 * (i + 1)] = tile_eye(1)
        elif i >= 7:
            start_col, start_row = i * 3, (i + 1) * 3
            num_ident = 3 - (i - 7) % 4
            end_row = start_row + 3 * num_ident
            if num_ident >= 1:
                base[i][start_row:end_row, start_col:start_col + 3] = tile_eye(num_ident)
    return base


def build_mapper(bone_trans: jnp.ndarray) -> jnp.ndarray:
    """mapped_reltrans = einsum('JMN,N->JM', makeBodyMapper(), bone_trans).reshape(23,23,3)."""
    base = jnp.asarray(make_body_mapper())                          # (23, 69, 66)
    mapped = jnp.einsum('JMN,N->JM', base, bone_trans.reshape(-1))  # (23, 69)
    return mapped.reshape(23, 23, 3)                                # (23, 23, 3)


# ----------------------------------------------------------------------------
# Pallas kernel: 6D -> rotation matrix + contraction with the mapper
# ----------------------------------------------------------------------------
def _make_body_maker_kernel(ch: int, n_chunks: int):
    """Kernel over one (6, J, TF) frame block, strip-mined into `n_chunks`
    chunks of `ch` lanes each (ch * n_chunks == TF)."""

    def kernel(x_ref, m_ref, o_ref):
        # x_ref : (6, J, TF)  x_ref[c, j, f]      (f32 or bf16)
        # m_ref : (3, J, J)   m_ref[n, l, j] = mapper[j, l, n]
        # o_ref : (3, J, TF)  o_ref[m, l, f] = out[f, l, m]
        eps2 = jnp.float32(1e-24)   # == (1e-12)^2, matches clamp on the norm

        # mapper is tiny (3x23x23); hoist the three (23,23) LHS tiles.
        m0 = m_ref[0]
        m1 = m_ref[1]
        m2 = m_ref[2]

        def chunk(i, carry):
            off = pl.multiple_of(i * ch, ch)      # ch is a multiple of 128
            sl = pl.ds(off, ch)

            a10 = x_ref[0, :, sl].astype(jnp.float32)
            a11 = x_ref[1, :, sl].astype(jnp.float32)
            a12 = x_ref[2, :, sl].astype(jnp.float32)
            a20 = x_ref[3, :, sl].astype(jnp.float32)
            a21 = x_ref[4, :, sl].astype(jnp.float32)
            a22 = x_ref[5, :, sl].astype(jnp.float32)

            # b1 = normalize(a1)  (rsqrt on the EUP instead of sqrt + divide)
            inv1 = lax.rsqrt(jnp.maximum(a10 * a10 + a11 * a11 + a12 * a12, eps2))
            b10 = a10 * inv1
            b11 = a11 * inv1
            b12 = a12 * inv1

            # b2 = normalize(a2 - <b1, a2> b1)
            d = b10 * a20 + b11 * a21 + b12 * a22
            u0 = a20 - d * b10
            u1 = a21 - d * b11
            u2 = a22 - d * b12
            inv2 = lax.rsqrt(jnp.maximum(u0 * u0 + u1 * u1 + u2 * u2, eps2))
            b20 = u0 * inv2
            b21 = u1 * inv2
            b22 = u2 * inv2

            # b3 = b1 x b2
            b30 = b11 * b22 - b12 * b21
            b31 = b12 * b20 - b10 * b22
            b32 = b10 * b21 - b11 * b20

            # out[m, l, f] = sum_n  M_n^T[l, j] @ b_{m,n}[j, f]
            rows = ((b10, b11, b12), (b20, b21, b22), (b30, b31, b32))
            for m in range(3):
                r0, r1, r2 = rows[m]
                acc = jnp.dot(m0, r0, preferred_element_type=jnp.float32)
                acc = acc + jnp.dot(m1, r1, preferred_element_type=jnp.float32)
                acc = acc + jnp.dot(m2, r2, preferred_element_type=jnp.float32)
                o_ref[m, :, sl] = acc.astype(o_ref.dtype)
            return carry

        unroll = n_chunks if n_chunks <= 4 else 2
        lax.fori_loop(0, n_chunks, chunk, 0, unroll=unroll)

    return kernel


# ----------------------------------------------------------------------------
# Wrappers
# ----------------------------------------------------------------------------
def body_maker_forward_cf(x_cf: jnp.ndarray, m_cf: jnp.ndarray,
                          *, tf_max: int = TF_MAX,
                          min_steps: int = MIN_STEPS) -> jnp.ndarray:
    """Components-first core (no HBM transposes, no pad/slice round trips).

    x_cf : (6, J, F)   x_cf[c, j, f] = orientation[f, j, c]   (f32 or bf16)
    m_cf : (3, J, J)   m_cf[n, l, j] = mapper[j, l, n]
    returns (3, J, F)  out_cf[m, l, f] = out[f, l, m]          (f32)
    """
    C, Jn, F_ = x_cf.shape
    assert C == 6 and Jn == J
    if x_cf.dtype not in (jnp.float32, jnp.bfloat16):
        x_cf = x_cf.astype(jnp.float32)

    # Lane tile: as large as allowed, but capped so the grid keeps >= min_steps
    # steps when F is large enough (v7x megacore sharding + pipeline overlap).
    tf_max = max(CH, _round_up(tf_max, 128))
    tf_cap = max(CH, _round_up(_cdiv(F_, max(min_steps, 1)), 128))
    tf = min(tf_max, tf_cap)

    n_chunks = tf // CH
    kernel = _make_body_maker_kernel(CH, n_chunks)

    # grid = cdiv(F, tf): the final block may be partial.  Undefined tail lanes
    # are harmless (all ops are lane-local; the matmul contracts sublanes) and
    # Pallas masks the out-of-range writeback.
    grid = (_cdiv(F_, tf),)

    out_cf = pl.pallas_call(
        kernel,
        out_shape=jax.ShapeDtypeStruct((3, J, F_), jnp.float32),
        grid_spec=pltpu.PrefetchScalarGridSpec(
            num_scalar_prefetch=0,
            grid=grid,
            in_specs=[
                pl.BlockSpec((6, J, tf), lambda i: (0, 0, i)),
                pl.BlockSpec((3, J, J), lambda i: (0, 0, 0)),   # grid-invariant
            ],
            out_specs=pl.BlockSpec((3, J, tf), lambda i: (0, 0, i)),
        ),
        compiler_params=pltpu.CompilerParams(
            dimension_semantics=("parallel",),      # F axis splits across TCs
            vmem_limit_bytes=32 * 1024 * 1024,      # safe headroom incl. v5e
        ),
    )(x_cf, m_cf.astype(jnp.float32))

    return out_cf


def body_maker_forward(orientation: jnp.ndarray, mapper: jnp.ndarray,
                       *, tf_max: int = TF_MAX) -> jnp.ndarray:
    """Interface-preserving adapter (debug / compatibility path only):
    (F,23,6), (23,23,3) -> (F,23,3).

    The two transposes here are full HBM round trips; production code should
    keep the components-first layout end-to-end and call
    body_maker_forward_cf directly (or fuse the transposes into the
    producer/consumer of `orientation`).
    """
    F_, Jn, C = orientation.shape
    assert Jn == J and C == 6

    x_cf = jnp.transpose(orientation, (2, 1, 0))                  # (6, J, F)
    m_cf = jnp.transpose(mapper.astype(jnp.float32), (2, 1, 0))   # (3, J, J)
    out_cf = body_maker_forward_cf(x_cf, m_cf, tf_max=tf_max)     # (3, J, F)
    return jnp.transpose(out_cf, (2, 1, 0))                       # (F, J, 3)


# ----------------------------------------------------------------------------
# Pure-JAX reference (for correctness check)
# ----------------------------------------------------------------------------
def rotation_6d_to_matrix_ref(d6):
    a1, a2 = d6[..., :3], d6[..., 3:]
    b1 = a1 / jnp.maximum(jnp.linalg.norm(a1, axis=-1, keepdims=True), 1e-12)
    b2 = a2 - jnp.sum(b1 * a2, axis=-1, keepdims=True) * b1
    b2 = b2 / jnp.maximum(jnp.linalg.norm(b2, axis=-1, keepdims=True), 1e-12)
    b3 = jnp.cross(b1, b2, axis=-1)
    return jnp.stack((b1, b2, b3), axis=-2)


def body_maker_ref(orientation, mapper):
    mat = rotation_6d_to_matrix_ref(orientation)                      # (F, 23, 3, 3)
    batched = jnp.einsum('FJMN,JLN->FJLM', mat, mapper)               # (F, 23, 23, 3)
    return jnp.sum(batched, axis=1)                                   # (F, 23, 3)


# ----------------------------------------------------------------------------
if __name__ == "__main__":
    key = jax.random.PRNGKey(0)
    k_bone, k_orient = jax.random.split(key)

    bone_trans = jax.random.normal(k_bone, (66,), dtype=jnp.float32)   # (22*3,)
    mapper = build_mapper(bone_trans)                                  # (23, 23, 3)

    # Test 1: tiny F (single partial block, no padding anywhere), adapter path.
    F_frames = 16
    orientation = jax.random.normal(k_orient, (F_frames, J, 6), dtype=jnp.float32)
    out = jax.block_until_ready(body_maker_forward(orientation, mapper))
    ref = jax.block_until_ready(body_maker_ref(orientation, mapper))
    assert out.shape == (F_frames, J, 3)
    assert np.allclose(np.asarray(out), np.asarray(ref), atol=2e-4, rtol=2e-4)

    # Test 2: non-multiple F with tf_max=128 -> 3 grid steps, partial final
    # block (exercises the padding-free ragged-tail path).
    F2 = 300
    orientation2 = jax.random.normal(jax.random.PRNGKey(1), (F2, J, 6),
                                     dtype=jnp.float32)
    out2 = jax.block_until_ready(body_maker_forward(orientation2, mapper, tf_max=128))
    ref2 = jax.block_until_ready(body_maker_ref(orientation2, mapper))
    assert out2.shape == (F2, J, 3)
    assert np.allclose(np.asarray(out2), np.asarray(ref2), atol=2e-4, rtol=2e-4)

    # Test 3: components-first fast path directly (no adapter transposes),
    # default tf_max, min_steps cap in effect.
    x_cf = jnp.transpose(orientation2, (2, 1, 0))                 # (6, J, F2)
    m_cf = jnp.transpose(mapper, (2, 1, 0))                       # (3, J, J)
    out_cf = jax.block_until_ready(body_maker_forward_cf(x_cf, m_cf))
    assert out_cf.shape == (3, J, F2)
    assert np.allclose(np.asarray(jnp.transpose(out_cf, (2, 1, 0))),
                       np.asarray(ref2), atol=2e-4, rtol=2e-4)

    print("KERNEL_OK")
</pallas_src>

<mosaic_0001>
module attributes {stable_mosaic.version = 11 : i64} {
  func.func @kernel(%arg0: i32, %arg1: memref<6x23x128xf32, #tpu.memory_space<vmem>>, %arg2: memref<3x23x23xf32, #tpu.memory_space<vmem>>, %arg3: memref<3x23x128xf32, #tpu.memory_space<vmem>>) attributes {dimension_semantics = [#tpu.dimension_semantics<parallel>], iteration_bounds = array<i64: 1>, scalar_prefetch = 0 : i64, scratch_operands = 0 : i64, tpu.core_type = #tpu.core_type<tc>, window_params = [{transform_indices = @transform_0, window_bounds = array<i64: 6, 23, 128>}, {pipeline_mode = #tpu.pipeline_mode<synchronous>, transform_indices = @transform_1, window_bounds = array<i64: 3, 23, 23>}, {transform_indices = @transform_2, window_bounds = array<i64: 3, 23, 128>}]} {
    %c0 = arith.constant 0 : index
    %c0_0 = arith.constant 0 : index
    %c0_1 = arith.constant 0 : index
    %0 = vector.load %arg2[%c0, %c0_0, %c0_1] : memref<3x23x23xf32, #tpu.memory_space<vmem>>, vector<1x23x23xf32>
    %1 = vector.shape_cast %0 : vector<1x23x23xf32> to vector<23x23xf32>
    %c1 = arith.constant 1 : index
    %c0_2 = arith.constant 0 : index
    %c0_3 = arith.constant 0 : index
    %2 = vector.load %arg2[%c1, %c0_2, %c0_3] : memref<3x23x23xf32, #tpu.memory_space<vmem>>, vector<1x23x23xf32>
    %3 = vector.shape_cast %2 : vector<1x23x23xf32> to vector<23x23xf32>
    %c2 = arith.constant 2 : index
    %c0_4 = arith.constant 0 : index
    %c0_5 = arith.constant 0 : index
    %4 = vector.load %arg2[%c2, %c0_4, %c0_5] : memref<3x23x23xf32, #tpu.memory_space<vmem>>, vector<1x23x23xf32>
    %5 = vector.shape_cast %4 : vector<1x23x23xf32> to vector<23x23xf32>
    %cst = arith.constant 1.000000e-24 : f32
    %c0_i32 = arith.constant 0 : i32
    %c128_i32 = arith.constant 128 : i32
    %6 = arith.muli %c0_i32, %c128_i32 : i32
    %7 = tpu.assume_multiple %6, 128 : i32
    %c0_6 = arith.constant 0 : index
    %c0_7 = arith.constant 0 : index
    %8 = arith.index_cast %7 : i32 to index
    %9 = vector.load %arg1[%c0_6, %c0_7, %8] : memref<6x23x128xf32, #tpu.memory_space<vmem>>, vector<1x23x128xf32>
    %10 = vector.shape_cast %9 : vector<1x23x128xf32> to vector<23x128xf32>
    %c1_8 = arith.constant 1 : index
    %c0_9 = arith.constant 0 : index
    %11 = arith.index_cast %7 : i32 to index
    %12 = vector.load %arg1[%c1_8, %c0_9, %11] : memref<6x23x128xf32, #tpu.memory_space<vmem>>, vector<1x23x128xf32>
    %13 = vector.shape_cast %12 : vector<1x23x128xf32> to vector<23x128xf32>
    %c2_10 = arith.constant 2 : index
    %c0_11 = arith.constant 0 : index
    %14 = arith.index_cast %7 : i32 to index
    %15 = vector.load %arg1[%c2_10, %c0_11, %14] : memref<6x23x128xf32, #tpu.memory_space<vmem>>, vector<1x23x128xf32>
    %16 = vector.shape_cast %15 : vector<1x23x128xf32> to vector<23x128xf32>
    %c3 = arith.constant 3 : index
    %c0_12 = arith.constant 0 : index
    %17 = arith.index_cast %7 : i32 to index
    %18 = vector.load %arg1[%c3, %c0_12, %17] : memref<6x23x128xf32, #tpu.memory_space<vmem>>, vector<1x23x128xf32>
    %19 = vector.shape_cast %18 : vector<1x23x128xf32> to vector<23x128xf32>
    %c4 = arith.constant 4 : index
    %c0_13 = arith.constant 0 : index
    %20 = arith.index_cast %7 : i32 to index
    %21 = vector.load %arg1[%c4, %c0_13, %20] : memref<6x23x128xf32, #tpu.memory_space<vmem>>, vector<1x23x128xf32>
    %22 = vector.shape_cast %21 : vector<1x23x128xf32> to vector<23x128xf32>
    %c5 = arith.constant 5 : index
    %c0_14 = arith.constant 0 : index
    %23 = arith.index_cast %7 : i32 to index
    %24 = vector.load %arg1[%c5, %c0_14, %23] : memref<6x23x128xf32, #tpu.memory_space<vmem>>, vector<1x23x128xf32>
    %25 = vector.shape_cast %24 : vector<1x23x128xf32> to vector<23x128xf32>
    %26 = arith.mulf %10, %10 : vector<23x128xf32>
    %27 = arith.mulf %13, %13 : vector<23x128xf32>
    %28 = arith.addf %26, %27 : vector<23x128xf32>
    %29 = arith.mulf %16, %16 : vector<23x128xf32>
    %30 = arith.addf %28, %29 : vector<23x128xf32>
    %31 = vector.broadcast %cst : f32 to vector<23x128xf32>
    %32 = arith.maximumf %30, %31 : vector<23x128xf32>
    %33 = math.rsqrt %32 : vector<23x128xf32>
    %34 = arith.mulf %10, %33 : vector<23x128xf32>
    %35 = arith.mulf %13, %33 : vector<23x128xf32>
    %36 = arith.mulf %16, %33 : vector<23x128xf32>
    %37 = arith.mulf %34, %19 : vector<23x128xf32>
    %38 = arith.mulf %35, %22 : vector<23x128xf32>
    %39 = arith.addf %37, %38 : vector<23x128xf32>
    %40 = arith.mulf %36, %25 : vector<23x128xf32>
    %41 = arith.addf %39, %40 : vector<23x128xf32>
    %42 = arith.mulf %41, %34 : vector<23x128xf32>
    %43 = arith.subf %19, %42 : vector<23x128xf32>
    %44 = arith.mulf %41, %35 : vector<23x128xf32>
    %45 = arith.subf %22, %44 : vector<23x128xf32>
    %46 = arith.mulf %41, %36 : vector<23x128xf32>
    %47 = arith.subf %25, %46 : vector<23x128xf32>
    %48 = arith.mulf %43, %43 : vector<23x128xf32>
    %49 = arith.mulf %45, %45 : vector<23x128xf32>
    %50 = arith.addf %48, %49 : vector<23x128xf32>
    %51 = arith.mulf %47, %47 : vector<23x128xf32>
    %52 = arith.addf %50, %51 : vector<23x128xf32>
    %53 = vector.broadcast %cst : f32 to vector<23x128xf32>
    %54 = arith.maximumf %52, %53 : vector<23x128xf32>
    %55 = math.rsqrt %54 : vector<23x128xf32>
    %56 = arith.mulf %43, %55 : vector<23x128xf32>
    %57 = arith.mulf %45, %55 : vector<23x128xf32>
    %58 = arith.mulf %47, %55 : vector<23x128xf32>
    %59 = arith.mulf %35, %58 : vector<23x128xf32>
    %60 = arith.mulf %36, %57 : vector<23x128xf32>
    %61 = arith.subf %59, %60 : vector<23x128xf32>
    %62 = arith.mulf %36, %56 : vector<23x128xf32>
    %63 = arith.mulf %34, %58 : vector<23x128xf32>
    %64 = arith.subf %62, %63 : vector<23x128xf32>
    %65 = arith.mulf %34, %57 : vector<23x128xf32>
    %66 = arith.mulf %35, %56 : vector<23x128xf32>
    %67 = arith.subf %65, %66 : vector<23x128xf32>
    %cst_15 = arith.constant dense<0.000000e+00> : vector<23x128xf32>
    %68 = tpu.matmul %1, %34, %cst_15 {dimension_numbers = #tpu.dot_dimension_numbers<[1], [0], [0], [1], [0, 0, 1, 1], [], []>} : vector<23x23xf32>, vector<23x128xf32>, vector<23x128xf32> -> vector<23x128xf32>
    %cst_16 = arith.constant dense<0.000000e+00> : vector<23x128xf32>
    %69 = tpu.matmul %3, %35, %cst_16 {dimension_numbers = #tpu.dot_dimension_numbers<[1], [0], [0], [1], [0, 0, 1, 1], [], []>} : vector<23x23xf32>, vector<23x128xf32>, vector<23x128xf32> -> vector<23x128xf32>
    %70 = arith.addf %68, %69 : vector<23x128xf32>
    %cst_17 = arith.constant dense<0.000000e+00> : vector<23x128xf32>
    %71 = tpu.matmul %5, %36, %cst_17 {dimension_numbers = #tpu.dot_dimension_numbers<[1], [0], [0], [1], [0, 0, 1, 1], [], []>} : vector<23x23xf32>, vector<23x128xf32>, vector<23x128xf32> -> vector<23x128xf32>
    %72 = arith.addf %70, %71 : vector<23x128xf32>
    %c0_18 = arith.constant 0 : index
    %c0_19 = arith.constant 0 : index
    %73 = arith.index_cast %7 : i32 to index
    %74 = vector.load %arg3[%c0_18, %c0_19, %73] : memref<3x23x128xf32, #tpu.memory_space<vmem>>, vector<1x23x128xf32>
    %75 = vector.shape_cast %74 : vector<1x23x128xf32> to vector<23x128xf32>
    %76 = vector.shape_cast %72 : vector<23x128xf32> to vector<1x23x128xf32>
    tpu.vector_store %arg3[%c0_18, %c0_19, %73], %76 {strides = array<i32>} : memref<3x23x128xf32, #tpu.memory_space<vmem>>, vector<1x23x128xf32>,
    %cst_20 = arith.constant dense<0.000000e+00> : vector<23x128xf32>
    %77 = tpu.matmul %1, %56, %cst_20 {dimension_numbers = #tpu.dot_dimension_numbers<[1], [0], [0], [1], [0, 0, 1, 1], [], []>} : vector<23x23xf32>, vector<23x128xf32>, vector<23x128xf32> -> vector<23x128xf32>
    %cst_21 = arith.constant dense<0.000000e+00> : vector<23x128xf32>
    %78 = tpu.matmul %3, %57, %cst_21 {dimension_numbers = #tpu.dot_dimension_numbers<[1], [0], [0], [1], [0, 0, 1, 1], [], []>} : vector<23x23xf32>, vector<23x128xf32>, vector<23x128xf32> -> vector<23x128xf32>
    %79 = arith.addf %77, %78 : vector<23x128xf32>
    %cst_22 = arith.constant dense<0.000000e+00> : vector<23x128xf32>
    %80 = tpu.matmul %5, %58, %cst_22 {dimension_numbers = #tpu.dot_dimension_numbers<[1], [0], [0], [1], [0, 0, 1, 1], [], []>} : vector<23x23xf32>, vector<23x128xf32>, vector<23x128xf32> -> vector<23x128xf32>
    %81 = arith.addf %79, %80 : vector<23x128xf32>
    %c1_23 = arith.constant 1 : index
    %c0_24 = arith.constant 0 : index
    %82 = arith.index_cast %7 : i32 to index
    %83 = vector.load %arg3[%c1_23, %c0_24, %82] : memref<3x23x128xf32, #tpu.memory_space<vmem>>, vector<1x23x128xf32>
    %84 = vector.shape_cast %83 : vector<1x23x128xf32> to vector<23x128xf32>
    %85 = vector.shape_cast %81 : vector<23x128xf32> to vector<1x23x128xf32>
    tpu.vector_store %arg3[%c1_23, %c0_24, %82], %85 {strides = array<i32>} : memref<3x23x128xf32, #tpu.memory_space<vmem>>, vector<1x23x128xf32>,
    %cst_25 = arith.constant dense<0.000000e+00> : vector<23x128xf32>
    %86 = tpu.matmul %1, %61, %cst_25 {dimension_numbers = #tpu.dot_dimension_numbers<[1], [0], [0], [1], [0, 0, 1, 1], [], []>} : vector<23x23xf32>, vector<23x128xf32>, vector<23x128xf32> -> vector<23x128xf32>
    %cst_26 = arith.constant dense<0.000000e+00> : vector<23x128xf32>
    %87 = tpu.matmul %3, %64, %cst_26 {dimension_numbers = #tpu.dot_dimension_numbers<[1], [0], [0], [1], [0, 0, 1, 1], [], []>} : vector<23x23xf32>, vector<23x128xf32>, vector<23x128xf32> -> vector<23x128xf32>
    %88 = arith.addf %86, %87 : vector<23x128xf32>
    %cst_27 = arith.constant dense<0.000000e+00> : vector<23x128xf32>
    %89 = tpu.matmul %5, %67, %cst_27 {dimension_numbers = #tpu.dot_dimension_numbers<[1], [0], [0], [1], [0, 0, 1, 1], [], []>} : vector<23x23xf32>, vector<23x128xf32>, vector<23x128xf32> -> vector<23x128xf32>
    %90 = arith.addf %88, %89 : vector<23x128xf32>
    %c2_28 = arith.constant 2 : index
    %c0_29 = arith.constant 0 : index
    %91 = arith.index_cast %7 : i32 to index
    %92 = vector.load %arg3[%c2_28, %c0_29, %91] : memref<3x23x128xf32, #tpu.memory_space<vmem>>, vector<1x23x128xf32>
    %93 = vector.shape_cast %92 : vector<1x23x128xf32> to vector<23x128xf32>
    %94 = vector.shape_cast %90 : vector<23x128xf32> to vector<1x23x128xf32>
    tpu.vector_store %arg3[%c2_28, %c0_29, %91], %94 {strides = array<i32>} : memref<3x23x128xf32, #tpu.memory_space<vmem>>, vector<1x23x128xf32>,
    %c1_i32 = arith.constant 1 : i32
    return
  }
  func.func @transform_0(%arg0: i32) -> (i32, i32, i32) {
    %c0_i32 = arith.constant 0 : i32
    %c0_i32_0 = arith.constant 0 : i32
    %c0_i32_1 = arith.constant 0 : i32
    return %c0_i32, %c0_i32_0, %arg0 : i32, i32, i32
  }
  func.func @transform_1(%arg0: i32) -> (i32, i32, i32) {
    %c0_i32 = arith.constant 0 : i32
    %c0_i32_0 = arith.constant 0 : i32
    %c0_i32_1 = arith.constant 0 : i32
    %c0_i32_2 = arith.constant 0 : i32
    return %c0_i32, %c0_i32_0, %c0_i32_1 : i32, i32, i32
  }
  func.func @transform_2(%arg0: i32) -> (i32, i32, i32) {
    %c0_i32 = arith.constant 0 : i32
    %c0_i32_0 = arith.constant 0 : i32
    %c0_i32_1 = arith.constant 0 : i32
    return %c0_i32, %c0_i32_0, %arg0 : i32, i32, i32
  }
}

</mosaic_0001>

<bundles_post_ra>
// kernel: tpu_custom_call.1
= control target key start
LH: loop header
LB: loop body
LE: loop exit
PB: predicated region body
PF: predicated region fallthrough
CT: control target
= control target key end

     0   :  { %vm234_vm9 = vcmask 1046528   ;;  %vm224_vm10 = vcmask 187392   ;;  %s979_s0 = inlined_call_operand.vmem [shape: f32[6,23,16], index: 0, kind: input, shape index: {}]   ;;  %s980_s1 = inlined_call_operand.vmem [shape: f32[3,23,23], index: 1, kind: input, shape index: {}]   ;;  %s981_s2 = inlined_call_operand.vmem [shape: f32[3,23,16], index: 2, kind: output, shape index: {}]  }
   0x1   :  { %v644_v0 = vld [vmem:[%s979_s0 + $0x10] sm:$0x7f]  ;;  %v553_v1 = vld [vmem:[%s979_s0 + $0x28] sm:$0x7f]  ;;  %v556_v2 = vld [vmem:[%s979_s0 + $0x40] sm:$0x7f] }
   0x2   :  { %v52_v3 = vmul.f32 %v644_v0, %v644_v0  ;;  %v55_v4 = vmul.f32 %v553_v1, %v553_v1  ;;  %v61_v5 = vmul.f32 %v556_v2, %v556_v2  ;;  %v657_v6 = vld [vmem:[%s979_s0 + $0x8] sm:$0xff]  ;;  %v552_v7 = vld [vmem:[%s979_s0 + $0x20] sm:$0xff]  ;;  %v555_v8 = vld [vmem:[%s979_s0 + $0x38] sm:$0xff] }
   0x3   :  { %v51_v9 = vmul.f32 %v657_v6, %v657_v6  ;;  %v54_v10 = vmul.f32 %v552_v7, %v552_v7  ;;  %v60_v11 = vmul.f32 %v555_v8, %v555_v8  ;;  %v670_v12 = vld [vmem:[%s979_s0] sm:$0xff]  ;;  %v675_v13 = vld [vmem:[%s979_s0 + $0x18] sm:$0xff]  ;;  %v680_v14 = vld [vmem:[%s979_s0 + $0x30] sm:$0xff] }
   0x4   :  { %v58_v15 = vadd.f32 %v55_v4, %v52_v3  ;;  %v50_v16 = vmul.f32 %v670_v12, %v670_v12  ;;  %v53_v17 = vmul.f32 %v675_v13, %v675_v13  ;;  %v59_v18 = vmul.f32 %v680_v14, %v680_v14  ;;  %v559_v46 = vld [vmem:[%s979_s0 + $0x58] sm:$0x7f]  ;;  %v562_v51 = vld [vmem:[%s979_s0 + $0x70] sm:$0x7f]  ;;  %v565_v52 = vld [vmem:[%s979_s0 + $0x88] sm:$0x7f] }
   0x5   :  { %v57_v19 = vadd.f32 %v54_v10, %v51_v9  ;;  %v558_v53 = vld [vmem:[%s979_s0 + $0x50] sm:$0xff]  ;;  %v561_v58 = vld [vmem:[%s979_s0 + $0x68] sm:$0xff]  ;;  %v564_v59 = vld [vmem:[%s979_s0 + $0x80] sm:$0xff] }
   0x6   :  { %v64_v20 = vadd.f32 %v61_v5, %v58_v15  ;;  %v56_v21 = vadd.f32 %v53_v17, %v50_v16  ;;  %v557_v60 = vld [vmem:[%s979_s0 + $0x48] sm:$0xff] }
   0x7   :  { %v63_v22 = vadd.f32 %v60_v11, %v57_v19 }
   0x8   :  { %v67_v23 = vmax.f32 %v64_v20, 1e-24  ;;  %v62_v24 = vadd.f32 %v59_v18, %v56_v21 }
   0x9   :  { %v66_v25 = vmax.f32 %v63_v22, 1e-24 }
   0xa   :  { %614 = vrsqrt.f32 %v67_v23  ;;  %v65_v26 = vmax.f32 %v62_v24, 1e-24  ;;  %vm94_vm0 = vweird.f32 %v67_v23 }
   0xb   :  { %616 = vrsqrt.f32 %v66_v25  ;;  %vm84_vm2 = vweird.f32 %v66_v25 }
   0xc   :  { %618 = vrsqrt.f32 %v65_v26  ;;  %vm74_vm4 = vweird.f32 %v65_v26 }
  0x10   :  { %v615_v27 = vpop.eup %614 }
  0x11   :  { %v617_v28 = vpop.eup %616  ;;  %v89_v29 = vmul.f32 %v615_v27, %v67_v23  ;;  %vm95_vm1 = vweird.f32 %v615_v27 }
  0x12   :  { %v619_v30 = vpop.eup %618  ;;  %v79_v31 = vmul.f32 %v617_v28, %v66_v25  ;;  %vm85_vm3 = vweird.f32 %v617_v28  ;;  %vm96_vm6 = vmor %vm94_vm0, %vm95_vm1 }
  0x13   :  { %v90_v32 = vmul.f32 %v615_v27, %v89_v29  ;;  %v69_v33 = vmul.f32 %v619_v30, %v65_v26  ;;  %vm75_vm5 = vweird.f32 %v619_v30  ;;  %vm86_vm7 = vmor %vm84_vm2, %vm85_vm3 }
  0x14   :  { %v80_v34 = vmul.f32 %v617_v28, %v79_v31  ;;  %vm76_vm8 = vmor %vm74_vm4, %vm75_vm5  ;;  %v813_v31 = vld [vmem:[%s980_s1] sm:$0xff] }
  0x15   :  { %v91_v35 = vmul.f32 0.5, %v90_v32  ;;  %v70_v36 = vmul.f32 %v619_v30, %v69_v33 }
  0x16   :  { %v81_v37 = vmul.f32 0.5, %v80_v34 }
  0x17   :  { %v92_v38 = vsub.f32 1.5, %v91_v35  ;;  %v71_v39 = vmul.f32 0.5, %v70_v36 }
  0x18   :  { %v82_v40 = vsub.f32 1.5, %v81_v37 }
  0x19   :  { %v93_v41 = vmul.f32 %v615_v27, %v92_v38  ;;  %v72_v42 = vsub.f32 1.5, %v71_v39 }
  0x1a   :  { %v83_v43 = vmul.f32 %v617_v28, %v82_v40 }
  0x1b   :  { %v97_v44 = vsel %vm96_vm6, %v615_v27, %v93_v41  ;;  %v73_v45 = vmul.f32 %v619_v30, %v72_v42 }
  0x1c   :  { %v691_v47 = vmul.f32 %v553_v1, %v97_v44  ;;  %v87_v48 = vsel %vm86_vm7, %v617_v28, %v83_v43  ;;  %v693_v49 = vmul.f32 %v556_v2, %v97_v44  ;;  %v696_v50 = vmul.f32 %v97_v44, %v644_v0  ;;  %v739_v0 = vld [vmem:[%s979_s0 + $0x60] sm:$0xff]  ;;  %v744_v1 = vld [vmem:[%s979_s0 + $0x78] sm:$0xff] }
  0x1d   :  { %v707_v54 = vmul.f32 %v552_v7, %v87_v48  ;;  %v77_v55 = vsel %vm76_vm8, %v619_v30, %v73_v45  ;;  %v709_v56 = vmul.f32 %v555_v8, %v87_v48  ;;  %v712_v57 = vmul.f32 %v87_v48, %v657_v6  ;;  %v756_v6 = vld [vmem:[%s980_s1 + $0x28] sm:$0x7f]  ;;  %v762_v7 = vld [vmem:[%s980_s1 + $0x20] sm:$0xff]  ;;  %v800_v28 = vld [vmem:[%s980_s1 + $0x18] sm:$0xff] }
  0x1e   :  { %609 = vmatpush.msk.msra.mxu2 %vm234_vm9, %v691_v47  ;;  %608 = vmatpush.msk.msra.mxu1 %vm234_vm9, %v691_v47  ;;  %v728_v61 = vmul.f32 %v675_v13, %v77_v55  ;;  %v731_v62 = vmul.f32 %v680_v14, %v77_v55  ;;  %v734_v63 = vmul.f32 %v77_v55, %v670_v12  ;;  %v807_v30 = vld [vmem:[%s980_s1 + $0x30] sm:$0xff] }
  0x1f   :  { %566 = vmatpush.msk.msra.mxu0 %vm234_vm9, %v691_v47  ;;  %v109_v2 = vmul.f32 %v559_v46, %v696_v50  ;;  %v112_v3 = vmul.f32 %v562_v51, %v691_v47  ;;  %v118_v4 = vmul.f32 %v565_v52, %v693_v49  ;;  %v108_v5 = vmul.f32 %v558_v53, %v712_v57 }
  0x20   :  { %611 = vmatpush.msra.mxu2 %v707_v54  ;;  %610 = vmatpush.msra.mxu1 %v707_v54  ;;  %v111_v8 = vmul.f32 %v561_v58, %v707_v54  ;;  %v117_v9 = vmul.f32 %v564_v59, %v709_v56  ;;  %v107_v10 = vmul.f32 %v557_v60, %v734_v63 }
  0x21   :  { %252 = vmatpush.msra.mxu0 %v707_v54  ;;  %v115_v11 = vadd.f32 %v112_v3, %v109_v2  ;;  %v110_v12 = vmul.f32 %v739_v0, %v728_v61  ;;  %v116_v13 = vmul.f32 %v744_v1, %v731_v62 }
  0x22   :  { %613 = vmatpush.msra.mxu2 %v728_v61  ;;  %612 = vmatpush.msra.mxu1 %v728_v61  ;;  %v114_v14 = vadd.f32 %v111_v8, %v108_v5 }
  0x23   :  { %569 = vmatmul.msk.f32.vlgmr.msra.gmra.mxu2 %vm224_vm10, %v756_v6  ;;  %568 = vmatmul.msk.f32.vlgmr.msra.gmra.mxu1 %vm224_vm10, %v762_v7  ;;  %v121_v15 = vadd.f32 %v118_v4, %v115_v11  ;;  %v113_v16 = vadd.f32 %v110_v12, %v107_v10  ;;  %v877_v11 = vld [vmem:[%s980_s1 + $0x10] sm:$0x7f] }
  0x24   :  { %574 = vmatpush.msk.msrb.mxu2 %vm234_vm9, %v693_v49  ;;  %570 = vmatpush.msk.msrb.mxu1 %vm234_vm9, %v696_v50  ;;  %v120_v17 = vadd.f32 %v117_v9, %v114_v14  ;;  %v872_v9 = vld [vmem:[%s980_s1 + $0x40] sm:$0x7f] }
  0x25   :  { %v124_v18 = vmul.f32 %v121_v15, %v696_v50  ;;  %v130_v19 = vmul.f32 %v121_v15, %v691_v47  ;;  %v136_v20 = vmul.f32 %v121_v15, %v693_v49  ;;  %253 = vmatpush.msra.mxu0 %v728_v61  ;;  %v119_v21 = vadd.f32 %v116_v13, %v113_v16 }
  0x26   :  { %328 = vmatpush.msrb.mxu2 %v709_v56  ;;  %290 = vmatpush.msrb.mxu1 %v712_v57  ;;  %v123_v22 = vmul.f32 %v120_v17, %v712_v57  ;;  %v129_v23 = vmul.f32 %v120_v17, %v707_v54  ;;  %v135_v24 = vmul.f32 %v120_v17, %v709_v56 }
  0x27   :  { %v791_v25 = vsub.f32 %v559_v46, %v124_v18  ;;  %v793_v26 = vsub.f32 %v562_v51, %v130_v19  ;;  %v795_v27 = vsub.f32 %v565_v52, %v136_v20  ;;  %v122_v29 = vmul.f32 %v119_v21, %v734_v63  ;;  %567 = vmatmul.msk.f32.vlgmr.msra.gmra.mxu0 %vm224_vm10, %v800_v28 }
  0x28   :  { %329 = vmatpush.msrb.mxu2 %v731_v62  ;;  %291 = vmatpush.msrb.mxu1 %v734_v63  ;;  %v815_v32 = vsub.f32 %v558_v53, %v123_v22  ;;  %v817_v33 = vsub.f32 %v561_v58, %v129_v23  ;;  %v819_v34 = vsub.f32 %v564_v59, %v135_v24 }
  0x29   :  { %v142_v35 = vmul.f32 %v791_v25, %v791_v25  ;;  %v145_v36 = vmul.f32 %v793_v26, %v793_v26  ;;  %v151_v37 = vmul.f32 %v795_v27, %v795_v27  ;;  %v829_v38 = vsub.f32 %v557_v60, %v122_v29  ;;  %v858_v60 = vld [vmem:[%s980_s1 + $0x38] sm:$0xff] }
  0x2a   :  { %v141_v39 = vmul.f32 %v815_v32, %v815_v32  ;;  %v144_v40 = vmul.f32 %v817_v33, %v817_v33  ;;  %v150_v41 = vmul.f32 %v819_v34, %v819_v34  ;;  %v128_v42 = vmul.f32 %v119_v21, %v728_v61 }
  0x2b   :  { %575 = vmatmul.msk.f32.vlgmr.msrb.gmra.mxu2 %vm224_vm10, %v807_v30  ;;  %571 = vmatmul.msk.f32.vlgmr.msrb.gmra.mxu1 %vm224_vm10, %v813_v31  ;;  %v148_v43 = vadd.f32 %v145_v36, %v142_v35  ;;  %v134_v44 = vmul.f32 %v119_v21, %v731_v62  ;;  %v140_v48 = vmul.f32 %v829_v38, %v829_v38 }
  0x2c   :  { %v147_v45 = vadd.f32 %v144_v40, %v141_v39  ;;  %v844_v46 = vsub.f32 %v739_v0, %v128_v42  ;;  %v863_v0 = vld [vmem:[%s980_s1 + $0x8] sm:$0xff] }
  0x2d   :  { %v154_v51 = vadd.f32 %v151_v37, %v148_v43  ;;  %v849_v52 = vsub.f32 %v744_v1, %v134_v44 }
  0x2e   :  { %v153_v53 = vadd.f32 %v150_v41, %v147_v45  ;;  %v143_v55 = vmul.f32 %v844_v46, %v844_v46 }
  0x2f   :  { %v157_v58 = vmax.f32 %v154_v51, 1e-24  ;;  %v149_v59 = vmul.f32 %v849_v52, %v849_v52 }
  0x30   :  { %v156_v1 = vmax.f32 %v153_v53, 1e-24  ;;  %v146_v2 = vadd.f32 %v143_v55, %v140_v48 }
  0x31   :  { %620 = vrsqrt.f32 %v157_v58  ;;  %vm184_vm11 = vweird.f32 %v157_v58 }
  0x32   :  { %622 = vrsqrt.f32 %v156_v1  ;;  %v152_v3 = vadd.f32 %v149_v59, %v146_v2  ;;  %vm174_vm13 = vweird.f32 %v156_v1 }
  0x33   :  { %576 = vmatmul.msk.f32.gmra.mxu2 %vm224_vm10, %v858_v60  ;;  %572 = vmatmul.msk.f32.gmra.mxu1 %vm224_vm10, %v863_v0 }
  0x34   :  { %v155_v4 = vmax.f32 %v152_v3, 1e-24 }
  0x36   :  { %624 = vrsqrt.f32 %v155_v4  ;;  %vm164_vm1 = vweird.f32 %v155_v4 }
  0x37   :  { %v621_v5 = vpop.eup %620 }
  0x38   :  { %v623_v8 = vpop.eup %622  ;;  %v179_v10 = vmul.f32 %v621_v5, %v157_v58  ;;  %vm185_vm12 = vweird.f32 %v621_v5 }
  0x39   :  { %v169_v12 = vmul.f32 %v623_v8, %v156_v1  ;;  %vm175_vm14 = vweird.f32 %v623_v8  ;;  %vm186_vm15 = vmor %vm184_vm11, %vm185_vm12 }
  0x3a   :  { %v180_v13 = vmul.f32 %v621_v5, %v179_v10  ;;  %vm176_vm0 = vmor %vm174_vm13, %vm175_vm14 }
  0x3b   :  { %577 = vmatmul.msk.f32.gmra.mxu2 %vm224_vm10, %v872_v9  ;;  %v170_v14 = vmul.f32 %v623_v8, %v169_v12  ;;  %573 = vmatmul.msk.f32.gmra.mxu1 %vm224_vm10, %v877_v11 }
  0x3c   :  { %v625_v15 = vpop.eup %624  ;;  %v181_v16 = vmul.f32 0.5, %v180_v13 }
  0x3d   :  { %v171_v17 = vmul.f32 0.5, %v170_v14  ;;  %v159_v18 = vmul.f32 %v625_v15, %v155_v4  ;;  %vm165_vm2 = vweird.f32 %v625_v15 }
  0x3e   :  { %v182_v19 = vsub.f32 1.5, %v181_v16  ;;  %vm166_vm3 = vmor %vm164_vm1, %vm165_vm2 }
  0x3f   :  { %v172_v20 = vsub.f32 1.5, %v171_v17  ;;  %v160_v21 = vmul.f32 %v625_v15, %v159_v18 }
  0x40   :  { %v183_v22 = vmul.f32 %v621_v5, %v182_v19 }
  0x41   :  { %v173_v23 = vmul.f32 %v623_v8, %v172_v20  ;;  %v161_v24 = vmul.f32 0.5, %v160_v21 }
  0x42   :  { %v187_v29 = vsel %vm186_vm15, %v621_v5, %v183_v22 }
  0x43   :  { %v193_v35 = vmul.f32 %v187_v29, %v793_v26  ;;  %v196_v36 = vmul.f32 %v187_v29, %v795_v27  ;;  %v177_v37 = vsel %vm176_vm0, %v623_v8, %v173_v23  ;;  %v162_v39 = vsub.f32 1.5, %v161_v24 }
  0x44   :  { %v192_v40 = vmul.f32 %v177_v37, %v817_v33  ;;  %v190_v41 = vmul.f32 %v187_v29, %v791_v25  ;;  %v189_v42 = vmul.f32 %v177_v37, %v815_v32  ;;  %v195_v43 = vmul.f32 %v177_v37, %v819_v34 }
  0x45   :  { %v217_v44 = vmul.f32 %v193_v35, %v696_v50  ;;  %578 = vmatpush.msk.msra.mxu3 %vm234_vm9, %v193_v35  ;;  %v163_v45 = vmul.f32 %v625_v15, %v162_v39  ;;  %v211_v26 = vmul.f32 %v196_v36, %v696_v50  ;;  %v199_v27 = vmul.f32 %v196_v36, %v691_v47 }
  0x46   :  { %v208_v48 = vmul.f32 %v190_v41, %v693_v49  ;;  %v220_v33 = vmul.f32 %v190_v41, %v691_v47  ;;  %582 = vmatpush.msk.msrb.mxu0 %vm234_vm9, %v190_v41  ;;  %v202_v25 = vmul.f32 %v193_v35, %v693_v49  ;;  %586 = vmatpush.msk.msra.mxu1 %vm234_vm9, %v196_v36 }
  0x47   :  { %363 = vmatpush.msra.mxu3 %v192_v40  ;;  %v167_v32 = vsel %vm166_vm3, %v625_v15, %v163_v45  ;;  %v207_v34 = vmul.f32 %v189_v42, %v709_v56  ;;  %v210_v51 = vmul.f32 %v195_v43, %v712_v57  ;;  %v198_v50 = vmul.f32 %v195_v43, %v707_v54 }
  0x48   :  { %v191_v53 = vmul.f32 %v167_v32, %v844_v46  ;;  %v214_v55 = vsub.f32 %v208_v48, %v211_v26  ;;  %v223_v58 = vsub.f32 %v217_v44, %v220_v33  ;;  %v205_v59 = vsub.f32 %v199_v27, %v202_v25  ;;  %392 = vmatpush.msrb.mxu0 %v189_v42 }
  0x49   :  { %v188_v47 = vmul.f32 %v167_v32, %v829_v38  ;;  %421 = vmatpush.msra.mxu1 %v195_v43  ;;  %v194_v49 = vmul.f32 %v167_v32, %v849_v52  ;;  %v213_v1 = vsub.f32 %v207_v34, %v210_v51  ;;  %v201_v2 = vmul.f32 %v192_v40, %v709_v56 }
  0x4a   :  { %364 = vmatpush.msra.mxu3 %v191_v53  ;;  %593 = vmatpush.msk.msra.mxu2 %vm234_vm9, %v214_v55  ;;  %v200_v3 = vmul.f32 %v191_v53, %v731_v62  ;;  %v216_v4 = vmul.f32 %v192_v40, %v712_v57  ;;  %v219_v46 = vmul.f32 %v189_v42, %v707_v54 }
  0x4b   :  { %579 = vmatmul.msk.f32.vlgmr.msra.gmra.mxu3 %vm224_vm10, %v800_v28  ;;  %393 = vmatpush.msrb.mxu0 %v188_v47  ;;  %v204_v38 = vsub.f32 %v198_v50, %v201_v2  ;;  %v206_v5 = vmul.f32 %v188_v47, %v731_v62  ;;  %v209_v52 = vmul.f32 %v194_v49, %v734_v63 }
  0x4c   :  { %597 = vmatpush.msk.msrb.mxu3 %vm234_vm9, %v205_v59  ;;  %583 = vmatmul.msk.f32.vlgmr.msrb.gmra.mxu0 %vm224_vm10, %v813_v31  ;;  %v197_v56 = vmul.f32 %v194_v49, %v728_v61  ;;  %v215_v57 = vmul.f32 %v191_v53, %v734_v63  ;;  %v222_v8 = vsub.f32 %v216_v4, %v219_v46 }
  0x4d   :  { %422 = vmatpush.msra.mxu1 %v194_v49  ;;  %457 = vmatpush.msra.mxu2 %v213_v1  ;;  %v212_v54 = vsub.f32 %v206_v5, %v209_v52  ;;  %v218_v10 = vmul.f32 %v188_v47, %v728_v61 }
  0x4e   :  { %587 = vmatmul.msk.f32.vlgmr.msra.gmra.mxu1 %vm224_vm10, %v807_v30  ;;  %486 = vmatpush.msrb.mxu3 %v204_v38  ;;  %v203_v62 = vsub.f32 %v197_v56, %v200_v3 }
  0x4f   :  { %601 = vmatpush.msk.msra.mxu0 %vm234_vm9, %v223_v58  ;;  %458 = vmatpush.msra.mxu2 %v212_v54  ;;  %v221_v12 = vsub.f32 %v215_v57, %v218_v10 }
  0x50   :  { %487 = vmatpush.msrb.mxu3 %v203_v62  ;;  %594 = vmatmul.msk.f32.vlgmr.msra.gmra.mxu2 %vm224_vm10, %v800_v28 }
  0x51   :  { %515 = vmatpush.msra.mxu0 %v222_v8 }
  0x53   :  { %580 = vmatmul.msk.f32.gmra.mxu3 %vm224_vm10, %v762_v7  ;;  %516 = vmatpush.msra.mxu0 %v221_v12 }
  0x54   :  { %584 = vmatmul.msk.f32.gmra.mxu0 %vm224_vm10, %v863_v0 }
  0x56   :  { %588 = vmatmul.msk.f32.gmra.mxu1 %vm224_vm10, %v858_v60 }
  0x58   :  { %595 = vmatmul.msk.f32.gmra.mxu2 %vm224_vm10, %v762_v7 }
  0x5b   :  { %581 = vmatmul.msk.f32.gmra.mxu3 %vm224_vm10, %v756_v6 }
  0x5c   :  { %585 = vmatmul.msk.f32.gmra.mxu0 %vm224_vm10, %v877_v11 }
  0x5e   :  { %589 = vmatmul.msk.f32.gmra.mxu1 %vm224_vm10, %v872_v9 }
  0x60   :  { %596 = vmatmul.msk.f32.gmra.mxu2 %vm224_vm10, %v756_v6 }
  0x63   :  { %598 = vmatmul.msk.f32.vlgmr.msrb.gmra.mxu3 %vm224_vm10, %v813_v31 }
  0x64   :  { %602 = vmatmul.msk.f32.vlgmr.msra.gmra.mxu0 %vm224_vm10, %v807_v30 }
  0x6b   :  { %599 = vmatmul.msk.f32.gmra.mxu3 %vm224_vm10, %v863_v0 }
  0x6c   :  { %603 = vmatmul.msk.f32.gmra.mxu0 %vm224_vm10, %v858_v60 }
  0x73   :  { %600 = vmatmul.msk.f32.gmra.mxu3 %vm224_vm10, %v877_v11 }
  0x74   :  { %604 = vmatmul.msk.f32.gmra.mxu0 %vm224_vm10, %v872_v9 }
  0xa0   :  { %v258_v61 = vpop.f32.mrf.mxu1 }
  0xa4   :  { %v255_v7 = vpop.f32.mrf.mxu0 }
  0xa6   :  { %v261_v63 = vpop.f32.mrf.mxu2 }
  0xa8   :  { %v293_v6 = vpop.f32.mrf.mxu1 }
  0xa9   :  { %v294_v28 = vadd.f32 %v293_v6, %v255_v7 }
  0xae   :  { %v331_v31 = vpop.f32.mrf.mxu2 }
  0xaf   :  { %v340_v13 = vadd.f32 %v331_v31, %v294_v28 }
  0xb0   :  { %v296_v30 = vpop.f32.mrf.mxu1 }
  0xb1   :  { %343 = vst [vmem:[%s981_s2] sm:$0xff] %v340_v13  ;;  %v297_v0 = vadd.f32 %v296_v30, %v258_v61 }
  0xb6   :  { %v334_v60 = vpop.f32.mrf.mxu2 }
  0xb7   :  { %v341_v14 = vadd.f32 %v334_v60, %v297_v0 }
  0xb8   :  { %v299_v15 = vpop.f32.mrf.mxu1 }
  0xb9   :  { %344 = vst [vmem:[%s981_s2 + $0x8] sm:$0xff] %v341_v14  ;;  %v300_v9 = vadd.f32 %v299_v15, %v261_v63 }
  0xbe   :  { %v337_v11 = vpop.f32.mrf.mxu2 }
  0xbf   :  { %v342_v16 = vadd.f32 %v337_v11, %v300_v9 }
  0xc1   :  { %345 = vst [vmem:[%s981_s2 + $0x10] sm:$0x7f] %v342_v16 }
  0xc9   :  { %v395_v17 = vpop.f32.mrf.mxu0 }
  0xcb   :  { %v424_v18 = vpop.f32.mrf.mxu1 }
  0xce   :  { %v366_v19 = vpop.f32.mrf.mxu3 }
  0xcf   :  { %v396_v20 = vadd.f32 %v395_v17, %v366_v19 }
  0xd1   :  { %v433_v21 = vadd.f32 %v424_v18, %v396_v20  ;;  %v398_v22 = vpop.f32.mrf.mxu0 }
  0xd3   :  { %590 = vst [vmem:[%s981_s2 + $0x18] sm:$0xff] %v433_v21  ;;  %v427_v23 = vpop.f32.mrf.mxu1  ;;  %v460_v41 = vpop.f32.mrf.mxu2 }
  0xd6   :  { %v369_v24 = vpop.f32.mrf.mxu3 }
  0xd7   :  { %v399_v29 = vadd.f32 %v398_v22, %v369_v24 }
  0xd9   :  { %v434_v35 = vadd.f32 %v427_v23, %v399_v29  ;;  %v401_v36 = vpop.f32.mrf.mxu0 }
  0xdb   :  { %591 = vst [vmem:[%s981_s2 + $0x20] sm:$0xff] %v434_v35  ;;  %v430_v39 = vpop.f32.mrf.mxu1  ;;  %v463_v27 = vpop.f32.mrf.mxu2 }
  0xde   :  { %v372_v37 = vpop.f32.mrf.mxu3 }
  0xdf   :  { %v402_v40 = vadd.f32 %v401_v36, %v372_v37 }
  0xe1   :  { %v435_v42 = vadd.f32 %v430_v39, %v402_v40  ;;  %v518_v43 = vpop.f32.mrf.mxu0 }
  0xe3   :  { %592 = vst [vmem:[%s981_s2 + $0x28] sm:$0x7f] %v435_v42  ;;  %v466_v34 = vpop.f32.mrf.mxu2 }
  0xe6   :  { %v489_v44 = vpop.f32.mrf.mxu3 }
  0xe7   :  { %v490_v45 = vadd.f32 %v489_v44, %v460_v41 }
  0xe9   :  { %v527_v26 = vadd.f32 %v518_v43, %v490_v45  ;;  %v521_v48 = vpop.f32.mrf.mxu0 }
  0xeb   :  { %605 = vst [vmem:[%s981_s2 + $0x30] sm:$0xff] %v527_v26 }
  0xee   :  { %v492_v33 = vpop.f32.mrf.mxu3 }
  0xef   :  { %v493_v25 = vadd.f32 %v492_v33, %v463_v27 }
  0xf1   :  { %v528_v32 = vadd.f32 %v521_v48, %v493_v25  ;;  %v524_v50 = vpop.f32.mrf.mxu0 }
  0xf3   :  { %606 = vst [vmem:[%s981_s2 + $0x38] sm:$0xff] %v528_v32 }
  0xf6   :  { %v495_v51 = vpop.f32.mrf.mxu3 }
  0xf7   :  { %v496_v53 = vadd.f32 %v495_v51, %v466_v34 }
  0xf9   :  { %v529_v55 = vadd.f32 %v524_v50, %v496_v53 }
  0xfb   :  { %607 = vst [vmem:[%s981_s2 + $0x40] sm:$0x7f] %v529_v55 }

</bundles_post_ra>
